<compile_context>
chip_gen: v7x
topology: tpu7x:2x2x1
jax: 0.10.0
libtpu: 0.0.40
codegen_flags: <defaults>
</compile_context>

<pallas_src>
import functools

import jax
import jax.numpy as jnp
from jax.experimental import pallas as pl
from jax.experimental.pallas import tpu as pltpu

_LANE = 128
_LOSS_BLOCK_BYTES = 1 << 20         # per-input block; 2 in x 2 buf = 4 MiB VMEM
_CLAMP_BLOCK_BYTES = 1 << 20        # per block; in+out double-buffered = 4 MiB VMEM
_FUSED_CLAMP_MAX_BYTES = 512 * 1024     # params <= this go through the fused batch
_FUSED_BATCH_VMEM_BYTES = 2 << 20       # input-side VMEM budget per fused clamp call


def _floor8(r):
    return (r // 8) * 8


# ----------------------------------------------------------------------------
# helpers (glue, plain JAX; native dtype, copy-free in the common case)
# ----------------------------------------------------------------------------
def _flat_slab(x):
    """Flatten x (native dtype) to a (rows, 128) lane-dense slab.

    Free reshape when numel % 128 == 0 (the common case); otherwise a single
    pad copy (rare -- discriminator outputs are normally lane-multiples)."""
    flat = x.reshape(-1)
    n = flat.shape[0]
    if n % _LANE == 0 and n > 0:
        return flat.reshape(n // _LANE, _LANE), n
    # Rare path: non-multiple-of-128 element count needs one pad copy.
    rows = -(-n // _LANE)
    flat = jnp.pad(flat, (0, rows * _LANE - n))
    return flat.reshape(rows, _LANE), n


def _pad_rows(slab, rows_to):
    rows = slab.shape[0]
    if rows_to > rows:
        # Only hit for tiny inputs (<8 rows) or mismatched fake/real sizes.
        slab = jnp.pad(slab, ((0, rows_to - rows), (0, 0)))
    return slab


def _lane_dense_view(p):
    """Free reshape of a parameter to a lane-dense 2-D view."""
    n = p.size
    if n % _LANE == 0 and n >= _LANE:
        return p.reshape(n // _LANE, _LANE)
    return p.reshape(1, max(n, 1))


def _vmem_estimate(x2d):
    """Approximate VMEM footprint of a 2-D array after (8,128) tiling."""
    r, c = x2d.shape
    return (-(-r // 8) * 8) * (-(-c // _LANE) * _LANE) * x2d.dtype.itemsize


# ----------------------------------------------------------------------------
# loss kernel: tiled sum-reduction over fake & real, scalar math in finalize
# ----------------------------------------------------------------------------
def _wgan_loss_kernel(fake_ref, real_ref, out_ref, acc_f, acc_r, *,
                      inv_nf, inv_nr, rows, block_rows, ragged):
    i = pl.program_id(0)
    last = pl.num_programs(0) - 1

    @pl.when(i == 0)
    def _init():
        acc_f[...] = jnp.zeros_like(acc_f)
        acc_r[...] = jnp.zeros_like(acc_r)

    def _accumulate(mask_rows):
        f = fake_ref[...].astype(jnp.float32)
        r = real_ref[...].astype(jnp.float32)
        if mask_rows:
            # last (partial) block: rows beyond the array are undefined -> zero
            row_id = jax.lax.broadcasted_iota(jnp.int32, (block_rows, _LANE), 0)
            valid = row_id < (rows - i * block_rows)
            f = jnp.where(valid, f, 0.0)
            r = jnp.where(valid, r, 0.0)
        # partial-sum each block down to one (8,128) vreg per input: pure VPU
        acc_f[...] += jnp.sum(f.reshape(block_rows // 8, 8, _LANE), axis=0)
        acc_r[...] += jnp.sum(r.reshape(block_rows // 8, 8, _LANE), axis=0)

    if ragged:
        # keep the iota/compare/select machinery off the hot (full-block) path
        @pl.when(i < last)
        def _hot():
            _accumulate(False)

        @pl.when(i == last)
        def _tail():
            _accumulate(True)
    else:
        _accumulate(False)

    @pl.when(i == last)
    def _finalize():
        mean_fake = jnp.sum(acc_f[...]) * inv_nf
        mean_real = jnp.sum(acc_r[...]) * inv_nr
        gen_cost = -mean_fake
        disc_cost = mean_fake - mean_real
        out_ref[0] = gen_cost
        out_ref[1] = disc_cost
        out_ref[2] = -disc_cost          # wasserstein


def _wgan_losses(disc_fake, disc_real):
    """Returns (gen_cost, disc_cost, wasserstein) as 0-d f32 arrays."""
    fake_slab, n_fake = _flat_slab(disc_fake)
    real_slab, n_real = _flat_slab(disc_real)

    # Shared row count so one grid covers both inputs. Padding only happens
    # for tiny inputs (<8 rows) or if fake/real differ in size (rare).
    rows = max(fake_slab.shape[0], real_slab.shape[0], 8)
    fake_slab = _pad_rows(fake_slab, rows)
    real_slab = _pad_rows(real_slab, rows)

    itemsize = max(fake_slab.dtype.itemsize, real_slab.dtype.itemsize)
    max_rows = max(8, _floor8(_LOSS_BLOCK_BYTES // (_LANE * itemsize)))
    block_rows = max(8, min(_floor8(rows), max_rows))
    grid = (pl.cdiv(rows, block_rows),)
    ragged = (rows % block_rows) != 0

    kernel = functools.partial(
        _wgan_loss_kernel,
        inv_nf=1.0 / float(n_fake),
        inv_nr=1.0 / float(n_real),
        rows=rows,
        block_rows=block_rows,
        ragged=ragged,
    )

    out = pl.pallas_call(
        kernel,
        out_shape=jax.ShapeDtypeStruct((3,), jnp.float32),
        grid_spec=pltpu.PrefetchScalarGridSpec(
            num_scalar_prefetch=0,
            grid=grid,
            in_specs=[
                pl.BlockSpec((block_rows, _LANE), lambda i: (i, 0)),
                pl.BlockSpec((block_rows, _LANE), lambda i: (i, 0)),
            ],
            out_specs=pl.BlockSpec(memory_space=pltpu.SMEM),
            scratch_shapes=[
                pltpu.VMEM((8, _LANE), jnp.float32),
                pltpu.VMEM((8, _LANE), jnp.float32),
            ],
        ),
        compiler_params=pltpu.CompilerParams(
            dimension_semantics=("arbitrary",)
        ),
    )(fake_slab, real_slab)
    return out[0], out[1], out[2]


# ----------------------------------------------------------------------------
# clamp kernels: elementwise weight clipping (WGAN critic weight clamp)
# ----------------------------------------------------------------------------
def _clamp_kernel(x_ref, o_ref, *, lo, hi):
    o_ref[...] = jnp.clip(x_ref[...], lo, hi)


def _clamp_many_kernel(*refs, lo, hi, n_arrays):
    # refs = (in_0..in_{k-1}, out_0..out_{k-1}); whole arrays resident in VMEM.
    for k in range(n_arrays):
        refs[n_arrays + k][...] = jnp.clip(refs[k][...], lo, hi)


def _clamp_param_tiled(p, lo, hi):
    """Streaming clamp for large parameters (lane-dense blocks, pipelined)."""
    n = p.size
    if n % _LANE == 0:
        slab = p.reshape(n // _LANE, _LANE)          # free reshape, no copy
        pad_back = False
    else:
        # Rare: large param whose size is not a multiple of 128 -> pad copy.
        rows = -(-n // _LANE)
        slab = jnp.pad(p.reshape(-1), (0, rows * _LANE - n)).reshape(rows, _LANE)
        pad_back = True

    rows = slab.shape[0]
    max_rows = max(8, _floor8(_CLAMP_BLOCK_BYTES // (_LANE * slab.dtype.itemsize)))
    block_rows = max(8, min(_floor8(rows), max_rows))
    grid = (pl.cdiv(rows, block_rows),)

    kernel = functools.partial(_clamp_kernel, lo=lo, hi=hi)
    out = pl.pallas_call(
        kernel,
        out_shape=jax.ShapeDtypeStruct(slab.shape, slab.dtype),
        grid_spec=pltpu.PrefetchScalarGridSpec(
            num_scalar_prefetch=0,
            grid=grid,
            in_specs=[pl.BlockSpec((block_rows, _LANE), lambda i: (i, 0))],
            out_specs=pl.BlockSpec((block_rows, _LANE), lambda i: (i, 0)),
        ),
        compiler_params=pltpu.CompilerParams(
            dimension_semantics=("parallel",)   # shards grid across v7x's 2 TCs
        ),
        input_output_aliases={0: 0},
    )(slab)
    if pad_back:
        out = out.reshape(-1)[:n]
    return out.reshape(p.shape)


def _clamp_params(params, lo, hi):
    """Clamp every parameter; small ones fused into O(1) pallas_calls."""
    lo, hi = float(lo), float(hi)
    results = [None] * len(params)

    batch = []          # list of (orig index, lane-dense view, orig shape)
    batch_vmem = 0

    def _flush():
        nonlocal batch, batch_vmem
        if not batch:
            return
        arrs = [a for _, a, _ in batch]
        k = len(arrs)
        kernel = functools.partial(_clamp_many_kernel, lo=lo, hi=hi, n_arrays=k)
        outs = pl.pallas_call(
            kernel,
            out_shape=tuple(jax.ShapeDtypeStruct(a.shape, a.dtype) for a in arrs),
            in_specs=[pl.BlockSpec(memory_space=pltpu.MemorySpace.VMEM)
                      for _ in arrs],
            out_specs=tuple(pl.BlockSpec(memory_space=pltpu.MemorySpace.VMEM)
                            for _ in arrs),
            input_output_aliases={i: i for i in range(k)},
        )(*arrs)
        if not isinstance(outs, (tuple, list)):
            outs = (outs,)
        for (idx, _, shp), o in zip(batch, outs):
            results[idx] = o.reshape(shp)
        batch = []
        batch_vmem = 0

    for idx, p in enumerate(params):
        nbytes = p.size * p.dtype.itemsize
        if nbytes > _FUSED_CLAMP_MAX_BYTES:
            results[idx] = _clamp_param_tiled(p, lo, hi)
        else:
            view = _lane_dense_view(p)
            est = _vmem_estimate(view)
            if batch and batch_vmem + est > _FUSED_BATCH_VMEM_BYTES:
                _flush()
            batch.append((idx, view, p.shape))
            batch_vmem += est
    _flush()
    return results


# ----------------------------------------------------------------------------
# WGANLoss module (JAX / Pallas)
# ----------------------------------------------------------------------------
class WGANLoss:
    def __init__(self, grad_penalty=False, clip_bounds=(-0.01, 0.01)):
        self.grad_penalty = grad_penalty
        if grad_penalty:
            print("GAN loss: {}".format("WGAN-GradPenalty"))
        else:
            self.clip_bounds = clip_bounds
            print("GAN loss: {}".format("WGAN"))

    def __call__(self, inputs):
        if not self.grad_penalty:
            disc_fake, disc_real, parameters = inputs
            disc_fake, disc_real = disc_fake[-1], disc_real[-1]
            gen_cost, disc_cost, wasserstein = _wgan_losses(disc_fake, disc_real)
            # PyTorch clamps parameters in place; JAX is functional, so the
            # clipped parameters are returned alongside the losses.
            # TODO(synk): true in-place clamping needs buffer donation
            # (donate_argnums) at the enclosing jit boundary; the clamp calls
            # already alias output onto input so donated buffers are reused.
            clipped = _clamp_params(parameters, self.clip_bounds[0],
                                    self.clip_bounds[1])
            return (gen_cost, disc_cost, wasserstein), clipped
        else:
            disc_fake, disc_real, gradient_penalty = inputs
            disc_fake, disc_real = disc_fake[-1], disc_real[-1]
            gen_cost, disc_cost, wasserstein = _wgan_losses(disc_fake, disc_real)
            disc_cost = disc_cost + gradient_penalty
            return (gen_cost, disc_cost, wasserstein), None


# ----------------------------------------------------------------------------
# demo
# ----------------------------------------------------------------------------
if __name__ == "__main__":
    key = jax.random.PRNGKey(0)
    k1, k2, k3, k4, k5, k6, k7, k8 = jax.random.split(key, 8)

    # Discriminator feature pyramids (lists); only the last element is used.
    # layout: NCHW, matching the PyTorch reference.
    disc_fake = [
        jax.random.normal(k1, (2, 1, 8, 8), jnp.float32),
        jax.random.normal(k1, (2, 4, 16, 16), jnp.float32),
    ]
    disc_real = [
        jax.random.normal(k2, (2, 1, 8, 8), jnp.float32) + 0.5,
        jax.random.normal(k2, (2, 4, 16, 16), jnp.float32) + 0.5,
    ]
    # Synthetic critic parameters: two small tensors (fused clamp path) and
    # one ~1.2 MiB tensor (tiled streaming clamp path with a ragged last block).
    parameters = [
        0.05 * jax.random.normal(k3, (4, 4, 3, 3), jnp.float32),   # conv weight
        0.05 * jax.random.normal(k4, (4,), jnp.float32),           # bias
        0.05 * jax.random.normal(k7, (300, 1024), jnp.float32),    # large weight
    ]

    loss_fn = WGANLoss(grad_penalty=False, clip_bounds=(-0.01, 0.01))
    (gen_cost, disc_cost, wasserstein), clipped = loss_fn(
        (disc_fake, disc_real, parameters)
    )
    jax.block_until_ready((gen_cost, disc_cost, wasserstein, clipped))

    # reference check (plain JAX)
    mf = jnp.mean(disc_fake[-1])
    mr = jnp.mean(disc_real[-1])
    assert jnp.allclose(gen_cost, -mf, atol=1e-5)
    assert jnp.allclose(disc_cost, mf - mr, atol=1e-5)
    assert jnp.allclose(wasserstein, -(mf - mr), atol=1e-5)
    for p, c in zip(parameters, clipped):
        assert c.shape == p.shape and c.dtype == p.dtype
        assert jnp.allclose(c, jnp.clip(p, -0.01, 0.01), atol=1e-7)

    # grad-penalty branch
    loss_fn_gp = WGANLoss(grad_penalty=True)
    (g2, d2, w2), _ = loss_fn_gp((disc_fake, disc_real, jnp.float32(0.3)))
    jax.block_until_ready((g2, d2, w2))
    assert jnp.allclose(d2, (mf - mr) + 0.3, atol=1e-5)

    # larger case: exercises multi-step streaming + masked ragged-tail path
    big_fake = jax.random.normal(k5, (2, 4, 100, 100), jnp.float32)
    big_real = jax.random.normal(k6, (2, 4, 100, 100), jnp.float32) + 0.1
    g3, d3, w3 = _wgan_losses(big_fake, big_real)
    jax.block_until_ready((g3, d3, w3))
    bmf = jnp.mean(big_fake)
    bmr = jnp.mean(big_real)
    assert jnp.allclose(g3, -bmf, atol=1e-5)
    assert jnp.allclose(d3, bmf - bmr, atol=1e-5)
    assert jnp.allclose(w3, -(bmf - bmr), atol=1e-5)

    print("KERNEL_OK")
</pallas_src>

<mosaic_0001>
module attributes {stable_mosaic.version = 11 : i64} {
  func.func @_wgan_loss_kernel(%arg0: i32, %arg1: memref<16x128xf32, #tpu.memory_space<vmem>>, %arg2: memref<16x128xf32, #tpu.memory_space<vmem>>, %arg3: memref<3xf32, #tpu.memory_space<smem>>, %arg4: memref<8x128xf32, #tpu.memory_space<vmem>>, %arg5: memref<8x128xf32, #tpu.memory_space<vmem>>) attributes {dimension_semantics = [#tpu.dimension_semantics<arbitrary>], iteration_bounds = array<i64: 1>, scalar_prefetch = 0 : i64, scratch_operands = 2 : i64, tpu.core_type = #tpu.core_type<tc>, window_params = [{transform_indices = @transform_0, window_bounds = array<i64: 16, 128>}, {transform_indices = @transform_1, window_bounds = array<i64: 16, 128>}, {transform_indices = @transform_2, window_bounds = array<i64: 3>}]} {
    %c0_i32 = arith.constant 0 : i32
    %0 = arith.cmpi eq, %arg0, %c0_i32 : i32
    %1 = arith.extui %0 : i1 to i32
    %c0_i32_0 = arith.constant 0 : i32
    %2 = arith.cmpi ne, %1, %c0_i32_0 : i32
    scf.if %2 {
      %cst_15 = arith.constant 0.000000e+00 : f32
      %18 = vector.broadcast %cst_15 : f32 to vector<8x128xf32>
      %c0_16 = arith.constant 0 : index
      %c0_17 = arith.constant 0 : index
      %19 = vector.load %arg4[%c0_16, %c0_17] : memref<8x128xf32, #tpu.memory_space<vmem>>, vector<8x128xf32>
      tpu.vector_store %arg4[%c0_16, %c0_17], %18 {strides = array<i32>} : memref<8x128xf32, #tpu.memory_space<vmem>>, vector<8x128xf32>,
      %cst_18 = arith.constant 0.000000e+00 : f32
      %20 = vector.broadcast %cst_18 : f32 to vector<8x128xf32>
      %c0_19 = arith.constant 0 : index
      %c0_20 = arith.constant 0 : index
      %21 = vector.load %arg5[%c0_19, %c0_20] : memref<8x128xf32, #tpu.memory_space<vmem>>, vector<8x128xf32>
      tpu.vector_store %arg5[%c0_19, %c0_20], %20 {strides = array<i32>} : memref<8x128xf32, #tpu.memory_space<vmem>>, vector<8x128xf32>,
    } else {
    }
    %c0 = arith.constant 0 : index
    %c0_1 = arith.constant 0 : index
    %3 = vector.load %arg1[%c0, %c0_1] : memref<16x128xf32, #tpu.memory_space<vmem>>, vector<16x128xf32>
    %c0_2 = arith.constant 0 : index
    %c0_3 = arith.constant 0 : index
    %4 = vector.load %arg2[%c0_2, %c0_3] : memref<16x128xf32, #tpu.memory_space<vmem>>, vector<16x128xf32>
    %c0_4 = arith.constant 0 : index
    %c0_5 = arith.constant 0 : index
    %5 = vector.load %arg4[%c0_4, %c0_5] : memref<8x128xf32, #tpu.memory_space<vmem>>, vector<8x128xf32>
    %6 = vector.shape_cast %3 : vector<16x128xf32> to vector<2x8x128xf32>
    %cst = arith.constant dense<0.000000e+00> : vector<8x128xf32>
    %7 = vector.multi_reduction <add>, %6, %cst [0] : vector<2x8x128xf32> to vector<8x128xf32>
    %8 = arith.addf %5, %7 : vector<8x128xf32>
    %c0_6 = arith.constant 0 : index
    %c0_7 = arith.constant 0 : index
    %9 = vector.load %arg4[%c0_6, %c0_7] : memref<8x128xf32, #tpu.memory_space<vmem>>, vector<8x128xf32>
    tpu.vector_store %arg4[%c0_6, %c0_7], %8 {strides = array<i32>} : memref<8x128xf32, #tpu.memory_space<vmem>>, vector<8x128xf32>,
    %c0_8 = arith.constant 0 : index
    %c0_9 = arith.constant 0 : index
    %10 = vector.load %arg5[%c0_8, %c0_9] : memref<8x128xf32, #tpu.memory_space<vmem>>, vector<8x128xf32>
    %11 = vector.shape_cast %4 : vector<16x128xf32> to vector<2x8x128xf32>
    %cst_10 = arith.constant dense<0.000000e+00> : vector<8x128xf32>
    %12 = vector.multi_reduction <add>, %11, %cst_10 [0] : vector<2x8x128xf32> to vector<8x128xf32>
    %13 = arith.addf %10, %12 : vector<8x128xf32>
    %c0_11 = arith.constant 0 : index
    %c0_12 = arith.constant 0 : index
    %14 = vector.load %arg5[%c0_11, %c0_12] : memref<8x128xf32, #tpu.memory_space<vmem>>, vector<8x128xf32>
    tpu.vector_store %arg5[%c0_11, %c0_12], %13 {strides = array<i32>} : memref<8x128xf32, #tpu.memory_space<vmem>>, vector<8x128xf32>,
    %c0_i32_13 = arith.constant 0 : i32
    %15 = arith.cmpi eq, %arg0, %c0_i32_13 : i32
    %16 = arith.extui %15 : i1 to i32
    %c0_i32_14 = arith.constant 0 : i32
    %17 = arith.cmpi ne, %16, %c0_i32_14 : i32
    scf.if %17 {
      %c0_15 = arith.constant 0 : index
      %c0_16 = arith.constant 0 : index
      %18 = vector.load %arg4[%c0_15, %c0_16] : memref<8x128xf32, #tpu.memory_space<vmem>>, vector<8x128xf32>
      %19 = vector.shape_cast %18 : vector<8x128xf32> to vector<1x8x128xf32>
      %cst_17 = arith.constant dense<0.000000e+00> : vector<1xf32>
      %20 = vector.multi_reduction <add>, %19, %cst_17 [1, 2] : vector<1x8x128xf32> to vector<1xf32>
      %21 = vector.shape_cast %20 : vector<1xf32> to vector<1x1x1xf32>
      %22 = vector.extract %21[0, 0, 0] : f32 from vector<1x1x1xf32>
      %cst_18 = arith.constant 4.8828125E-4 : f32
      %23 = arith.mulf %22, %cst_18 : f32
      %c0_19 = arith.constant 0 : index
      %c0_20 = arith.constant 0 : index
      %24 = vector.load %arg5[%c0_19, %c0_20] : memref<8x128xf32, #tpu.memory_space<vmem>>, vector<8x128xf32>
      %25 = vector.shape_cast %24 : vector<8x128xf32> to vector<1x8x128xf32>
      %cst_21 = arith.constant dense<0.000000e+00> : vector<1xf32>
      %26 = vector.multi_reduction <add>, %25, %cst_21 [1, 2] : vector<1x8x128xf32> to vector<1xf32>
      %27 = vector.shape_cast %26 : vector<1xf32> to vector<1x1x1xf32>
      %28 = vector.extract %27[0, 0, 0] : f32 from vector<1x1x1xf32>
      %cst_22 = arith.constant 4.8828125E-4 : f32
      %29 = arith.mulf %28, %cst_22 : f32
      %cst_23 = arith.constant 0.000000e+00 : f32
      %30 = arith.subf %cst_23, %23 : f32
      %31 = arith.subf %23, %29 : f32
      %c0_24 = arith.constant 0 : index
      %32 = memref.load %arg3[%c0_24] : memref<3xf32, #tpu.memory_space<smem>>
      memref.store %30, %arg3[%c0_24] : memref<3xf32, #tpu.memory_space<smem>>
      %c1 = arith.constant 1 : index
      %33 = memref.load %arg3[%c1] : memref<3xf32, #tpu.memory_space<smem>>
      memref.store %31, %arg3[%c1] : memref<3xf32, #tpu.memory_space<smem>>
      %cst_25 = arith.constant 0.000000e+00 : f32
      %34 = arith.subf %cst_25, %31 : f32
      %c2 = arith.constant 2 : index
      %35 = memref.load %arg3[%c2] : memref<3xf32, #tpu.memory_space<smem>>
      memref.store %34, %arg3[%c2] : memref<3xf32, #tpu.memory_space<smem>>
    } else {
    }
    return
  }
  func.func @transform_0(%arg0: i32) -> (i32, i32) {
    %c0_i32 = arith.constant 0 : i32
    %c0_i32_0 = arith.constant 0 : i32
    return %arg0, %c0_i32 : i32, i32
  }
  func.func @transform_1(%arg0: i32) -> (i32, i32) {
    %c0_i32 = arith.constant 0 : i32
    %c0_i32_0 = arith.constant 0 : i32
    return %arg0, %c0_i32 : i32, i32
  }
  func.func @transform_2(%arg0: i32) -> i32 {
    %c0_i32 = arith.constant 0 : i32
    %c0_i32_0 = arith.constant 0 : i32
    return %c0_i32 : i32
  }
}

</mosaic_0001>

<bundles_post_ra>
// kernel: tpu_custom_call.1
= control target key start
LH: loop header
LB: loop body
LE: loop exit
PB: predicated region body
PF: predicated region fallthrough
CT: control target
= control target key end

     0   :  { %7 = vsyncpa [#allocation5], 0  ;;  %s232_s0 = inlined_call_operand.hbm [shape: f32[16,128], index: 0, kind: input, shape index: {}]   ;;  %s233_s1 = inlined_call_operand.hbm [shape: f32[16,128], index: 1, kind: input, shape index: {}]   ;;  %s234_s2 = inlined_call_operand.hbm [shape: f32[3], index: 2, kind: output, shape index: {}]  }
   0x1   :  { %8 = vsyncpa [#allocation8], 0 }
   0x2   :  { %9 = vsyncpa [#allocation6], 0  ;;  %s176_s9 = smov [#allocation4]   ;;  %s116_s13 = scalar_lea.hbm %s232_s0, 256 }
   0x3   :  { %s15_s10 = sshll.u32 %s176_s9, 4  ;;  %p117_p0 = scmp.ne.s32.totalorder %s232_s0, %s116_s13  ;;  %s16_s10 = int_to_ptr.vmem [resolvable:$true] %s15_s10 }
   0x4   :  { %p120_p1 = scmp.lt.u32.totalorder %s116_s13, %s232_s0 }
   0x6   :  { %p122_p2 = pnand %p120_p1, %p117_p0 }
   0x8   :  { %125 = shalt.err (!%p122_p2)
}
   0x9   :  { %s126_s18 = scalar_lea.vmem %s16_s10, 256  ;;  %p131_p4 = scmp.lt.s32.totalorder %s16_s10, %s16_s10 }
   0xa   :  { %p127_p3 = scmp.ne.s32.totalorder %s16_s10, %s126_s18  ;;  %p132_p5 = scmp.lt.s32.totalorder %s126_s18, %s126_s18 }
   0xc   :  { %p133_p6 = por %p132_p5, %p131_p4 }
   0xe   :  { %p134_p7 = pnand %p133_p6, %p127_p3 }
  0x10   :  { %137 = shalt.err (!%p134_p7)
}
  0x11   :  { %s177_s19 = smov 128   ;;  %s178_s20 = smov 8  }
  0x12   :  { %21 = dma.hbm_to_vmem [thread:$0]  %s232_s0, 256, %s16_s10, [#allocation5], %s177_s19, %s177_s19, %s178_s20  }
  0x13   :  { %s179_s23 = smov [#allocation7]   ;;  %s138_s27 = scalar_lea.hbm %s233_s1, 256 }
  0x14   :  { %s27_s24 = sshll.u32 %s179_s23, 4  ;;  %p139_p8 = scmp.ne.s32.totalorder %s233_s1, %s138_s27  ;;  %s28_s24 = int_to_ptr.vmem [resolvable:$true] %s27_s24 }
  0x15   :  { %p142_p9 = scmp.lt.u32.totalorder %s138_s27, %s233_s1 }
  0x17   :  { %p144_p10 = pnand %p142_p9, %p139_p8 }
  0x19   :  { %147 = shalt.err (!%p144_p10)
}
  0x1a   :  { %s148_s4 = scalar_lea.vmem %s28_s24, 256  ;;  %p153_p12 = scmp.lt.s32.totalorder %s28_s24, %s28_s24 }
  0x1b   :  { %p149_p11 = scmp.ne.s32.totalorder %s28_s24, %s148_s4  ;;  %p154_p13 = scmp.lt.s32.totalorder %s148_s4, %s148_s4 }
  0x1d   :  { %p155_p0 = por %p154_p13, %p153_p12 }
  0x1f   :  { %p156_p1 = pnand %p155_p0, %p149_p11 }
  0x21   :  { %159 = shalt.err (!%p156_p1)
}
  0x22   :  { %33 = dma.hbm_to_vmem [thread:$0]  %s233_s1, 256, %s28_s24, [#allocation8], %s177_s19, %s177_s19, %s178_s20  }
  0x23   :  { %170 = dma.done.wait [#allocation5], 256  }
  0x24   :  { %171 = vsyncadd [#allocation5], 4294967040 }
  0x25   :  { %172 = dma.done.wait [#allocation8], 256  }
  0x26   :  { %173 = vsyncadd [#allocation8], 4294967040  ;;  %v46_v0 = vld [vmem:[#allocation4] sm:$0xff]  ;;  %v47_v1 = vld [vmem:[#allocation4 + $0x8] sm:$0xff]  ;;  %s160_s14 = scalar_lea.hbm %s234_s2, 16 }
  0x27   :  { %v48_v2 = vld [vmem:[#allocation7] sm:$0xff]  ;;  %v51_v3 = vadd.f32 %v47_v1, %v46_v0  ;;  %v49_v4 = vld [vmem:[#allocation7 + $0x8] sm:$0xff]  ;;  %p161_p2 = scmp.ne.s32.totalorder %s234_s2, %s160_s14  ;;  %p164_p3 = scmp.lt.u32.totalorder %s160_s14, %s234_s2 }
  0x28   :  { %v55_v5 = vadd.f32 %v49_v4, %v48_v2 }
  0x29   :  { %62 = vadd.xlane.f32.xlu0 %v51_v3  ;;  %p166_p4 = pnand %p164_p3, %p161_p2 }
  0x2d   :  { %73 = vadd.xlane.f32.xlu0 %v55_v5 }
  0xb6   :  { %v63_v6 = vpop.xlane.xlu0 %62 }
  0xb7   :  { %v64_v7 = vrot.slane %v63_v6, 4 }
  0xb9   :  { %v65_v8 = vadd.f32 %v64_v7, %v63_v6 }
  0xba   :  { %v74_v9 = vpop.xlane.xlu0 %73 }
  0xbb   :  { %v66_v10 = vrot.slane %v65_v8, 2  ;;  %v75_v11 = vrot.slane %v74_v9, 4 }
  0xbd   :  { %v76_v12 = vadd.f32 %v75_v11, %v74_v9  ;;  %v67_v13 = vadd.f32 %v66_v10, %v65_v8 }
  0xbf   :  { %v77_v14 = vrot.slane %v76_v12, 2  ;;  %v68_v15 = vrot.slane %v67_v13, 1 }
  0xc1   :  { %v78_v16 = vadd.f32 %v77_v14, %v76_v12  ;;  %v69_v17 = vadd.f32 %v68_v15, %v67_v13 }
  0xc3   :  { %107 = vpush %v69_v17  ;;  %v79_v18 = vrot.slane %v78_v16, 1 }
  0xc5   :  { %v80_v19 = vadd.f32 %v79_v18, %v78_v16 }
  0xc7   :  { %109 = vpush %v80_v19 }
  0xf4   :  { %s108_s1 = spop %107 }
  0xf5   :  { %s71_s6 = smul.f32 0.00048828125, %s108_s1 }
  0xf7   :  { %s83_s7 = ssub.f32 0.0, %s71_s6 }
  0xf8   :  { %s110_s8 = spop %109 }
  0xf9   :  { %86 = sst [smem:[#allocation9]] %s83_s7  ;;  %s82_s9 = smul.f32 0.00048828125, %s110_s8 }
  0xfb   :  { %s84_s10 = ssub.f32 %s71_s6, %s82_s9 }
  0xfd   :  { %88 = sst [smem:[#allocation9 + $0x1]] %s84_s10 }
  0xfe   :  { %s89_s11 = ssub.f32 0.0, %s84_s10 }
 0x100   :  { %91 = sst [smem:[#allocation9 + $0x2]] %s89_s11 }
 0x101   :  { %169 = shalt.err (!%p166_p4)
}
 0x102   :  { %s180_s19 = smov [#allocation9]  }
 0x103   :  { %99 = dma.smem_to_hbm %s180_s19, 16, %s234_s2, [#allocation6]  }
 0x104   :  { %174 = dma.done.wait [#allocation6], 16  }
 0x105   :  { %175 = vsyncadd [#allocation6], 4294967280 }
 0x106   :  { %103 = sfence }
 0x107   :  { %104 = vsyncpa [#allocation5], 1 }
 0x108   :  { %105 = vsyncpa [#allocation8], 1 }
 0x109   :  { %106 = vsyncpa [#allocation6], 1 }

</bundles_post_ra>
